<compile_context>
chip_gen: v6e
topology: v6e:2x2x1
jax: 0.10.0
libtpu: 0.0.40
codegen_flags: <defaults>
</compile_context>

<pallas_src>
import jax
import jax.numpy as jnp
from jax.experimental import pallas as pl
from jax.experimental.pallas import tpu as pltpu


def torch_model_kernel(xp_ref, whh1_ref, w2_ref, wcls_ref, bcls_ref, out_ref):
    # xp_ref:  (S, B, H)  pre-projected input x @ wih1, time-major
    # whh1:    (H, H)     layer-1 recurrent weight (pre-transposed)
    # w2:      (2H, H)    concat([wih2, whh2], axis=0) (pre-transposed)
    # wcls:    (1, H)     classifier weight as a lane row
    # bcls:    (1,) SMEM  classifier bias
    # out:     (B, 1)
    S, B, H = xp_ref.shape

    whh1 = whh1_ref[...]
    w2 = w2_ref[...]

    h1 = jnp.zeros((B, H), jnp.float32)
    h2 = jnp.zeros((B, H), jnp.float32)
    acc = jnp.zeros((B, H), jnp.float32)

    # Static unroll over the (small) sequence length. S is tiny (8); for
    # larger S switch to lax.fori_loop(..., unroll=True) with (h1,h2,acc) carry.
    for t in range(S):
        # layer 1: input projection already applied -> one recurrent matmul
        h1 = jnp.tanh(xp_ref[t]
                      + jnp.dot(h1, whh1, preferred_element_type=jnp.float32))
        # layer 2: fused input+recurrent matmul via K-concatenation
        h12 = jnp.concatenate([h1, h2], axis=-1)          # (B, 2H)
        h2 = jnp.tanh(jnp.dot(h12, w2, preferred_element_type=jnp.float32))

        # Online BatchNorm1d(sentence_length) for channel t: mean / biased var
        # over (B, H), gamma=1, beta=0, eps=1e-5; fused with AvgPool (sum here).
        m = jnp.mean(h2, keepdims=True)                   # (1, 1)
        c = h2 - m
        v = jnp.mean(c * c, keepdims=True)                # (1, 1)
        acc = acc + c * jax.lax.rsqrt(v + 1e-5)

    pooled = acc * (1.0 / S)                              # (B, H) == avg over time

    # Linear(H, 1): VPU multiply + lane reduce instead of an N=1 MXU matvec.
    logits = jnp.sum(pooled * wcls_ref[...], axis=-1, keepdims=True) + bcls_ref[0]
    out_ref[...] = jax.nn.sigmoid(logits)                 # (B, 1)


def init_params(vocab_size, vector_dim, hidden_size, key):
    ks = jax.random.split(key, 7)
    emb = 0.1 * jax.random.normal(ks[0], (vocab_size, vector_dim), jnp.float32)
    emb = emb.at[0].set(0.0)                              # padding_idx=0
    s_h = 1.0 / (hidden_size ** 0.5)
    return {
        "embedding": emb,
        # stored pre-transposed so the kernel computes x @ W
        "wih1": jax.random.uniform(ks[1], (vector_dim, hidden_size), jnp.float32, -s_h, s_h),
        "whh1": jax.random.uniform(ks[2], (hidden_size, hidden_size), jnp.float32, -s_h, s_h),
        "wih2": jax.random.uniform(ks[3], (hidden_size, hidden_size), jnp.float32, -s_h, s_h),
        "whh2": jax.random.uniform(ks[4], (hidden_size, hidden_size), jnp.float32, -s_h, s_h),
        "wcls": jax.random.uniform(ks[5], (hidden_size, 1), jnp.float32, -s_h, s_h),
        "bcls": jax.random.uniform(ks[6], (1,), jnp.float32, -s_h, s_h),
    }


def torch_model_forward(x_tokens, params):
    B, S = x_tokens.shape
    H = params["whh1"].shape[0]

    # Glue (plain JAX): fold the layer-1 input projection into the embedding
    # table (exact same math: emb[tok] @ wih1 == (emb @ wih1)[tok]), gather,
    # and go time-major so the kernel reads contiguous (B, H) slabs per step.
    proj_emb = jnp.dot(params["embedding"], params["wih1"],
                       preferred_element_type=jnp.float32)        # (V, H)
    xp = jnp.take(proj_emb, x_tokens, axis=0)                     # (B, S, H)
    xp = jnp.transpose(xp, (1, 0, 2)).astype(jnp.float32)         # (S, B, H)

    # Merge layer-2 weights along K for the fused per-step matmul.
    w2 = jnp.concatenate([params["wih2"], params["whh2"]], axis=0)  # (2H, H)
    wcls_row = params["wcls"].reshape(1, H)                         # (1, H)

    vmem = pl.BlockSpec(memory_space=pltpu.MemorySpace.VMEM)
    smem = pl.BlockSpec(memory_space=pltpu.MemorySpace.SMEM)

    return pl.pallas_call(
        torch_model_kernel,
        out_shape=jax.ShapeDtypeStruct((B, 1), jnp.float32),
        in_specs=[vmem, vmem, vmem, vmem, smem],
        out_specs=vmem,
    )(xp, params["whh1"], w2, wcls_row, params["bcls"])


def reference_forward(x_tokens, params):
    # pure-JAX reference of the original (unfused) math, for sanity check only
    x = jnp.take(params["embedding"], x_tokens, axis=0)
    B, S, D = x.shape
    H = params["whh1"].shape[0]
    h1 = jnp.zeros((B, H), jnp.float32)
    h2 = jnp.zeros((B, H), jnp.float32)
    outs = []
    for t in range(S):
        h1 = jnp.tanh(x[:, t, :] @ params["wih1"] + h1 @ params["whh1"])
        h2 = jnp.tanh(h1 @ params["wih2"] + h2 @ params["whh2"])
        outs.append(h2)
    out = jnp.stack(outs, axis=1)                       # (B, S, H)
    mean = jnp.mean(out, axis=(0, 2), keepdims=True)    # per-channel (per t)
    var = jnp.mean((out - mean) ** 2, axis=(0, 2), keepdims=True)
    xbn = (out - mean) / jnp.sqrt(var + 1e-5)
    pooled = jnp.mean(xbn, axis=1)                      # (B, H)
    return jax.nn.sigmoid(pooled @ params["wcls"] + params["bcls"][0])


if __name__ == "__main__":
    # small shapes consistent with the module
    vocab_size = 30        # len(vocab)
    vector_dim = 16        # embedding dim
    sentence_length = 8    # S
    hidden_size = 32       # H
    batch = 4

    key = jax.random.PRNGKey(0)
    k_tok, k_par = jax.random.split(key)
    params = init_params(vocab_size, vector_dim, hidden_size, k_par)
    x_tokens = jax.random.randint(k_tok, (batch, sentence_length), 0, vocab_size,
                                  dtype=jnp.int32)

    y_pred = torch_model_forward(x_tokens, params)
    y_pred = jax.block_until_ready(y_pred)

    y_ref = reference_forward(x_tokens, params)
    assert y_pred.shape == (batch, 1)
    assert jnp.allclose(y_pred, y_ref, atol=2e-3), (y_pred, y_ref)

    print("KERNEL_OK")
</pallas_src>

<mosaic_0001>
module attributes {stable_mosaic.version = 11 : i64} {
  func.func @torch_model_kernel(%arg0: memref<8x4x32xf32, #tpu.memory_space<vmem>>, %arg1: memref<32x32xf32, #tpu.memory_space<vmem>>, %arg2: memref<64x32xf32, #tpu.memory_space<vmem>>, %arg3: memref<1x32xf32, #tpu.memory_space<vmem>>, %arg4: memref<1xf32, #tpu.memory_space<smem>>, %arg5: memref<4x1xf32, #tpu.memory_space<vmem>>) attributes {dimension_semantics = [], scalar_prefetch = 0 : i64, scratch_operands = 0 : i64, tpu.core_type = #tpu.core_type<tc>} {
    %c0 = arith.constant 0 : index
    %c0_0 = arith.constant 0 : index
    %0 = vector.load %arg1[%c0, %c0_0] : memref<32x32xf32, #tpu.memory_space<vmem>>, vector<32x32xf32>
    %c0_1 = arith.constant 0 : index
    %c0_2 = arith.constant 0 : index
    %1 = vector.load %arg2[%c0_1, %c0_2] : memref<64x32xf32, #tpu.memory_space<vmem>>, vector<64x32xf32>
    %cst = arith.constant 0.000000e+00 : f32
    %2 = vector.broadcast %cst : f32 to vector<4x32xf32>
    %cst_3 = arith.constant 0.000000e+00 : f32
    %3 = vector.broadcast %cst_3 : f32 to vector<4x32xf32>
    %cst_4 = arith.constant 0.000000e+00 : f32
    %4 = vector.broadcast %cst_4 : f32 to vector<4x32xf32>
    %c0_5 = arith.constant 0 : index
    %c0_6 = arith.constant 0 : index
    %c0_7 = arith.constant 0 : index
    %5 = vector.load %arg0[%c0_5, %c0_6, %c0_7] : memref<8x4x32xf32, #tpu.memory_space<vmem>>, vector<1x4x32xf32>
    %6 = vector.shape_cast %5 : vector<1x4x32xf32> to vector<4x32xf32>
    %cst_8 = arith.constant dense<0.000000e+00> : vector<4x32xf32>
    %7 = tpu.matmul %2, %0, %cst_8 {dimension_numbers = #tpu.dot_dimension_numbers<[1], [0], [0], [1], [0, 0, 1, 1], [], []>} : vector<4x32xf32>, vector<32x32xf32>, vector<4x32xf32> -> vector<4x32xf32>
    %8 = arith.addf %6, %7 : vector<4x32xf32>
    %9 = math.tanh %8 : vector<4x32xf32>
    %10 = tpu.concatenate %9, %3 in 1 : vector<4x32xf32>, vector<4x32xf32> -> vector<4x64xf32>
    %cst_9 = arith.constant dense<0.000000e+00> : vector<4x32xf32>
    %11 = tpu.matmul %10, %1, %cst_9 {dimension_numbers = #tpu.dot_dimension_numbers<[1], [0], [0], [1], [0, 0, 1, 1], [], []>} : vector<4x64xf32>, vector<64x32xf32>, vector<4x32xf32> -> vector<4x32xf32>
    %12 = math.tanh %11 : vector<4x32xf32>
    %13 = vector.shape_cast %12 : vector<4x32xf32> to vector<1x4x32xf32>
    %cst_10 = arith.constant dense<0.000000e+00> : vector<1xf32>
    %14 = vector.multi_reduction <add>, %13, %cst_10 [1, 2] : vector<1x4x32xf32> to vector<1xf32>
    %15 = vector.shape_cast %14 : vector<1xf32> to vector<1x1x1xf32>
    %16 = vector.extract %15[0, 0, 0] : f32 from vector<1x1x1xf32>
    %17 = vector.broadcast %16 : f32 to vector<1x1xf32>
    %cst_11 = arith.constant 1.280000e+02 : f32
    %18 = vector.broadcast %cst_11 : f32 to vector<1x1xf32>
    %19 = arith.divf %17, %18 : vector<1x1xf32>
    %20 = vector.broadcast %19 : vector<1x1xf32> to vector<4x32xf32>
    %21 = arith.subf %12, %20 : vector<4x32xf32>
    %22 = arith.mulf %21, %21 : vector<4x32xf32>
    %23 = vector.shape_cast %22 : vector<4x32xf32> to vector<1x4x32xf32>
    %cst_12 = arith.constant dense<0.000000e+00> : vector<1xf32>
    %24 = vector.multi_reduction <add>, %23, %cst_12 [1, 2] : vector<1x4x32xf32> to vector<1xf32>
    %25 = vector.shape_cast %24 : vector<1xf32> to vector<1x1x1xf32>
    %26 = vector.extract %25[0, 0, 0] : f32 from vector<1x1x1xf32>
    %27 = vector.broadcast %26 : f32 to vector<1x1xf32>
    %cst_13 = arith.constant 1.280000e+02 : f32
    %28 = vector.broadcast %cst_13 : f32 to vector<1x1xf32>
    %29 = arith.divf %27, %28 : vector<1x1xf32>
    %cst_14 = arith.constant 9.99999974E-6 : f32
    %30 = vector.broadcast %cst_14 : f32 to vector<1x1xf32>
    %31 = arith.addf %29, %30 : vector<1x1xf32>
    %32 = math.rsqrt %31 : vector<1x1xf32>
    %33 = vector.broadcast %32 : vector<1x1xf32> to vector<4x32xf32>
    %34 = arith.mulf %21, %33 : vector<4x32xf32>
    %35 = arith.addf %4, %34 : vector<4x32xf32>
    %c1 = arith.constant 1 : index
    %c0_15 = arith.constant 0 : index
    %c0_16 = arith.constant 0 : index
    %36 = vector.load %arg0[%c1, %c0_15, %c0_16] : memref<8x4x32xf32, #tpu.memory_space<vmem>>, vector<1x4x32xf32>
    %37 = vector.shape_cast %36 : vector<1x4x32xf32> to vector<4x32xf32>
    %cst_17 = arith.constant dense<0.000000e+00> : vector<4x32xf32>
    %38 = tpu.matmul %9, %0, %cst_17 {dimension_numbers = #tpu.dot_dimension_numbers<[1], [0], [0], [1], [0, 0, 1, 1], [], []>} : vector<4x32xf32>, vector<32x32xf32>, vector<4x32xf32> -> vector<4x32xf32>
    %39 = arith.addf %37, %38 : vector<4x32xf32>
    %40 = math.tanh %39 : vector<4x32xf32>
    %41 = tpu.concatenate %40, %12 in 1 : vector<4x32xf32>, vector<4x32xf32> -> vector<4x64xf32>
    %cst_18 = arith.constant dense<0.000000e+00> : vector<4x32xf32>
    %42 = tpu.matmul %41, %1, %cst_18 {dimension_numbers = #tpu.dot_dimension_numbers<[1], [0], [0], [1], [0, 0, 1, 1], [], []>} : vector<4x64xf32>, vector<64x32xf32>, vector<4x32xf32> -> vector<4x32xf32>
    %43 = math.tanh %42 : vector<4x32xf32>
    %44 = vector.shape_cast %43 : vector<4x32xf32> to vector<1x4x32xf32>
    %cst_19 = arith.constant dense<0.000000e+00> : vector<1xf32>
    %45 = vector.multi_reduction <add>, %44, %cst_19 [1, 2] : vector<1x4x32xf32> to vector<1xf32>
    %46 = vector.shape_cast %45 : vector<1xf32> to vector<1x1x1xf32>
    %47 = vector.extract %46[0, 0, 0] : f32 from vector<1x1x1xf32>
    %48 = vector.broadcast %47 : f32 to vector<1x1xf32>
    %cst_20 = arith.constant 1.280000e+02 : f32
    %49 = vector.broadcast %cst_20 : f32 to vector<1x1xf32>
    %50 = arith.divf %48, %49 : vector<1x1xf32>
    %51 = vector.broadcast %50 : vector<1x1xf32> to vector<4x32xf32>
    %52 = arith.subf %43, %51 : vector<4x32xf32>
    %53 = arith.mulf %52, %52 : vector<4x32xf32>
    %54 = vector.shape_cast %53 : vector<4x32xf32> to vector<1x4x32xf32>
    %cst_21 = arith.constant dense<0.000000e+00> : vector<1xf32>
    %55 = vector.multi_reduction <add>, %54, %cst_21 [1, 2] : vector<1x4x32xf32> to vector<1xf32>
    %56 = vector.shape_cast %55 : vector<1xf32> to vector<1x1x1xf32>
    %57 = vector.extract %56[0, 0, 0] : f32 from vector<1x1x1xf32>
    %58 = vector.broadcast %57 : f32 to vector<1x1xf32>
    %cst_22 = arith.constant 1.280000e+02 : f32
    %59 = vector.broadcast %cst_22 : f32 to vector<1x1xf32>
    %60 = arith.divf %58, %59 : vector<1x1xf32>
    %cst_23 = arith.constant 9.99999974E-6 : f32
    %61 = vector.broadcast %cst_23 : f32 to vector<1x1xf32>
    %62 = arith.addf %60, %61 : vector<1x1xf32>
    %63 = math.rsqrt %62 : vector<1x1xf32>
    %64 = vector.broadcast %63 : vector<1x1xf32> to vector<4x32xf32>
    %65 = arith.mulf %52, %64 : vector<4x32xf32>
    %66 = arith.addf %35, %65 : vector<4x32xf32>
    %c2 = arith.constant 2 : index
    %c0_24 = arith.constant 0 : index
    %c0_25 = arith.constant 0 : index
    %67 = vector.load %arg0[%c2, %c0_24, %c0_25] : memref<8x4x32xf32, #tpu.memory_space<vmem>>, vector<1x4x32xf32>
    %68 = vector.shape_cast %67 : vector<1x4x32xf32> to vector<4x32xf32>
    %cst_26 = arith.constant dense<0.000000e+00> : vector<4x32xf32>
    %69 = tpu.matmul %40, %0, %cst_26 {dimension_numbers = #tpu.dot_dimension_numbers<[1], [0], [0], [1], [0, 0, 1, 1], [], []>} : vector<4x32xf32>, vector<32x32xf32>, vector<4x32xf32> -> vector<4x32xf32>
    %70 = arith.addf %68, %69 : vector<4x32xf32>
    %71 = math.tanh %70 : vector<4x32xf32>
    %72 = tpu.concatenate %71, %43 in 1 : vector<4x32xf32>, vector<4x32xf32> -> vector<4x64xf32>
    %cst_27 = arith.constant dense<0.000000e+00> : vector<4x32xf32>
    %73 = tpu.matmul %72, %1, %cst_27 {dimension_numbers = #tpu.dot_dimension_numbers<[1], [0], [0], [1], [0, 0, 1, 1], [], []>} : vector<4x64xf32>, vector<64x32xf32>, vector<4x32xf32> -> vector<4x32xf32>
    %74 = math.tanh %73 : vector<4x32xf32>
    %75 = vector.shape_cast %74 : vector<4x32xf32> to vector<1x4x32xf32>
    %cst_28 = arith.constant dense<0.000000e+00> : vector<1xf32>
    %76 = vector.multi_reduction <add>, %75, %cst_28 [1, 2] : vector<1x4x32xf32> to vector<1xf32>
    %77 = vector.shape_cast %76 : vector<1xf32> to vector<1x1x1xf32>
    %78 = vector.extract %77[0, 0, 0] : f32 from vector<1x1x1xf32>
    %79 = vector.broadcast %78 : f32 to vector<1x1xf32>
    %cst_29 = arith.constant 1.280000e+02 : f32
    %80 = vector.broadcast %cst_29 : f32 to vector<1x1xf32>
    %81 = arith.divf %79, %80 : vector<1x1xf32>
    %82 = vector.broadcast %81 : vector<1x1xf32> to vector<4x32xf32>
    %83 = arith.subf %74, %82 : vector<4x32xf32>
    %84 = arith.mulf %83, %83 : vector<4x32xf32>
    %85 = vector.shape_cast %84 : vector<4x32xf32> to vector<1x4x32xf32>
    %cst_30 = arith.constant dense<0.000000e+00> : vector<1xf32>
    %86 = vector.multi_reduction <add>, %85, %cst_30 [1, 2] : vector<1x4x32xf32> to vector<1xf32>
    %87 = vector.shape_cast %86 : vector<1xf32> to vector<1x1x1xf32>
    %88 = vector.extract %87[0, 0, 0] : f32 from vector<1x1x1xf32>
    %89 = vector.broadcast %88 : f32 to vector<1x1xf32>
    %cst_31 = arith.constant 1.280000e+02 : f32
    %90 = vector.broadcast %cst_31 : f32 to vector<1x1xf32>
    %91 = arith.divf %89, %90 : vector<1x1xf32>
    %cst_32 = arith.constant 9.99999974E-6 : f32
    %92 = vector.broadcast %cst_32 : f32 to vector<1x1xf32>
    %93 = arith.addf %91, %92 : vector<1x1xf32>
    %94 = math.rsqrt %93 : vector<1x1xf32>
    %95 = vector.broadcast %94 : vector<1x1xf32> to vector<4x32xf32>
    %96 = arith.mulf %83, %95 : vector<4x32xf32>
    %97 = arith.addf %66, %96 : vector<4x32xf32>
    %c3 = arith.constant 3 : index
    %c0_33 = arith.constant 0 : index
    %c0_34 = arith.constant 0 : index
    %98 = vector.load %arg0[%c3, %c0_33, %c0_34] : memref<8x4x32xf32, #tpu.memory_space<vmem>>, vector<1x4x32xf32>
    %99 = vector.shape_cast %98 : vector<1x4x32xf32> to vector<4x32xf32>
    %cst_35 = arith.constant dense<0.000000e+00> : vector<4x32xf32>
    %100 = tpu.matmul %71, %0, %cst_35 {dimension_numbers = #tpu.dot_dimension_numbers<[1], [0], [0], [1], [0, 0, 1, 1], [], []>} : vector<4x32xf32>, vector<32x32xf32>, vector<4x32xf32> -> vector<4x32xf32>
    %101 = arith.addf %99, %100 : vector<4x32xf32>
    %102 = math.tanh %101 : vector<4x32xf32>
    %103 = tpu.concatenate %102, %74 in 1 : vector<4x32xf32>, vector<4x32xf32> -> vector<4x64xf32>
    %cst_36 = arith.constant dense<0.000000e+00> : vector<4x32xf32>
    %104 = tpu.matmul %103, %1, %cst_36 {dimension_numbers = #tpu.dot_dimension_numbers<[1], [0], [0], [1], [0, 0, 1, 1], [], []>} : vector<4x64xf32>, vector<64x32xf32>, vector<4x32xf32> -> vector<4x32xf32>
    %105 = math.tanh %104 : vector<4x32xf32>
    %106 = vector.shape_cast %105 : vector<4x32xf32> to vector<1x4x32xf32>
    %cst_37 = arith.constant dense<0.000000e+00> : vector<1xf32>
    %107 = vector.multi_reduction <add>, %106, %cst_37 [1, 2] : vector<1x4x32xf32> to vector<1xf32>
    %108 = vector.shape_cast %107 : vector<1xf32> to vector<1x1x1xf32>
    %109 = vector.extract %108[0, 0, 0] : f32 from vector<1x1x1xf32>
    %110 = vector.broadcast %109 : f32 to vector<1x1xf32>
    %cst_38 = arith.constant 1.280000e+02 : f32
    %111 = vector.broadcast %cst_38 : f32 to vector<1x1xf32>
    %112 = arith.divf %110, %111 : vector<1x1xf32>
    %113 = vector.broadcast %112 : vector<1x1xf32> to vector<4x32xf32>
    %114 = arith.subf %105, %113 : vector<4x32xf32>
    %115 = arith.mulf %114, %114 : vector<4x32xf32>
    %116 = vector.shape_cast %115 : vector<4x32xf32> to vector<1x4x32xf32>
    %cst_39 = arith.constant dense<0.000000e+00> : vector<1xf32>
    %117 = vector.multi_reduction <add>, %116, %cst_39 [1, 2] : vector<1x4x32xf32> to vector<1xf32>
    %118 = vector.shape_cast %117 : vector<1xf32> to vector<1x1x1xf32>
    %119 = vector.extract %118[0, 0, 0] : f32 from vector<1x1x1xf32>
    %120 = vector.broadcast %119 : f32 to vector<1x1xf32>
    %cst_40 = arith.constant 1.280000e+02 : f32
    %121 = vector.broadcast %cst_40 : f32 to vector<1x1xf32>
    %122 = arith.divf %120, %121 : vector<1x1xf32>
    %cst_41 = arith.constant 9.99999974E-6 : f32
    %123 = vector.broadcast %cst_41 : f32 to vector<1x1xf32>
    %124 = arith.addf %122, %123 : vector<1x1xf32>
    %125 = math.rsqrt %124 : vector<1x1xf32>
    %126 = vector.broadcast %125 : vector<1x1xf32> to vector<4x32xf32>
    %127 = arith.mulf %114, %126 : vector<4x32xf32>
    %128 = arith.addf %97, %127 : vector<4x32xf32>
    %c4 = arith.constant 4 : index
    %c0_42 = arith.constant 0 : index
    %c0_43 = arith.constant 0 : index
    %129 = vector.load %arg0[%c4, %c0_42, %c0_43] : memref<8x4x32xf32, #tpu.memory_space<vmem>>, vector<1x4x32xf32>
    %130 = vector.shape_cast %129 : vector<1x4x32xf32> to vector<4x32xf32>
    %cst_44 = arith.constant dense<0.000000e+00> : vector<4x32xf32>
    %131 = tpu.matmul %102, %0, %cst_44 {dimension_numbers = #tpu.dot_dimension_numbers<[1], [0], [0], [1], [0, 0, 1, 1], [], []>} : vector<4x32xf32>, vector<32x32xf32>, vector<4x32xf32> -> vector<4x32xf32>
    %132 = arith.addf %130, %131 : vector<4x32xf32>
    %133 = math.tanh %132 : vector<4x32xf32>
    %134 = tpu.concatenate %133, %105 in 1 : vector<4x32xf32>, vector<4x32xf32> -> vector<4x64xf32>
    %cst_45 = arith.constant dense<0.000000e+00> : vector<4x32xf32>
    %135 = tpu.matmul %134, %1, %cst_45 {dimension_numbers = #tpu.dot_dimension_numbers<[1], [0], [0], [1], [0, 0, 1, 1], [], []>} : vector<4x64xf32>, vector<64x32xf32>, vector<4x32xf32> -> vector<4x32xf32>
    %136 = math.tanh %135 : vector<4x32xf32>
    %137 = vector.shape_cast %136 : vector<4x32xf32> to vector<1x4x32xf32>
    %cst_46 = arith.constant dense<0.000000e+00> : vector<1xf32>
    %138 = vector.multi_reduction <add>, %137, %cst_46 [1, 2] : vector<1x4x32xf32> to vector<1xf32>
    %139 = vector.shape_cast %138 : vector<1xf32> to vector<1x1x1xf32>
    %140 = vector.extract %139[0, 0, 0] : f32 from vector<1x1x1xf32>
    %141 = vector.broadcast %140 : f32 to vector<1x1xf32>
    %cst_47 = arith.constant 1.280000e+02 : f32
    %142 = vector.broadcast %cst_47 : f32 to vector<1x1xf32>
    %143 = arith.divf %141, %142 : vector<1x1xf32>
    %144 = vector.broadcast %143 : vector<1x1xf32> to vector<4x32xf32>
    %145 = arith.subf %136, %144 : vector<4x32xf32>
    %146 = arith.mulf %145, %145 : vector<4x32xf32>
    %147 = vector.shape_cast %146 : vector<4x32xf32> to vector<1x4x32xf32>
    %cst_48 = arith.constant dense<0.000000e+00> : vector<1xf32>
    %148 = vector.multi_reduction <add>, %147, %cst_48 [1, 2] : vector<1x4x32xf32> to vector<1xf32>
    %149 = vector.shape_cast %148 : vector<1xf32> to vector<1x1x1xf32>
    %150 = vector.extract %149[0, 0, 0] : f32 from vector<1x1x1xf32>
    %151 = vector.broadcast %150 : f32 to vector<1x1xf32>
    %cst_49 = arith.constant 1.280000e+02 : f32
    %152 = vector.broadcast %cst_49 : f32 to vector<1x1xf32>
    %153 = arith.divf %151, %152 : vector<1x1xf32>
    %cst_50 = arith.constant 9.99999974E-6 : f32
    %154 = vector.broadcast %cst_50 : f32 to vector<1x1xf32>
    %155 = arith.addf %153, %154 : vector<1x1xf32>
    %156 = math.rsqrt %155 : vector<1x1xf32>
    %157 = vector.broadcast %156 : vector<1x1xf32> to vector<4x32xf32>
    %158 = arith.mulf %145, %157 : vector<4x32xf32>
    %159 = arith.addf %128, %158 : vector<4x32xf32>
    %c5 = arith.constant 5 : index
    %c0_51 = arith.constant 0 : index
    %c0_52 = arith.constant 0 : index
    %160 = vector.load %arg0[%c5, %c0_51, %c0_52] : memref<8x4x32xf32, #tpu.memory_space<vmem>>, vector<1x4x32xf32>
    %161 = vector.shape_cast %160 : vector<1x4x32xf32> to vector<4x32xf32>
    %cst_53 = arith.constant dense<0.000000e+00> : vector<4x32xf32>
    %162 = tpu.matmul %133, %0, %cst_53 {dimension_numbers = #tpu.dot_dimension_numbers<[1], [0], [0], [1], [0, 0, 1, 1], [], []>} : vector<4x32xf32>, vector<32x32xf32>, vector<4x32xf32> -> vector<4x32xf32>
    %163 = arith.addf %161, %162 : vector<4x32xf32>
    %164 = math.tanh %163 : vector<4x32xf32>
    %165 = tpu.concatenate %164, %136 in 1 : vector<4x32xf32>, vector<4x32xf32> -> vector<4x64xf32>
    %cst_54 = arith.constant dense<0.000000e+00> : vector<4x32xf32>
    %166 = tpu.matmul %165, %1, %cst_54 {dimension_numbers = #tpu.dot_dimension_numbers<[1], [0], [0], [1], [0, 0, 1, 1], [], []>} : vector<4x64xf32>, vector<64x32xf32>, vector<4x32xf32> -> vector<4x32xf32>
    %167 = math.tanh %166 : vector<4x32xf32>
    %168 = vector.shape_cast %167 : vector<4x32xf32> to vector<1x4x32xf32>
    %cst_55 = arith.constant dense<0.000000e+00> : vector<1xf32>
    %169 = vector.multi_reduction <add>, %168, %cst_55 [1, 2] : vector<1x4x32xf32> to vector<1xf32>
    %170 = vector.shape_cast %169 : vector<1xf32> to vector<1x1x1xf32>
    %171 = vector.extract %170[0, 0, 0] : f32 from vector<1x1x1xf32>
    %172 = vector.broadcast %171 : f32 to vector<1x1xf32>
    %cst_56 = arith.constant 1.280000e+02 : f32
    %173 = vector.broadcast %cst_56 : f32 to vector<1x1xf32>
    %174 = arith.divf %172, %173 : vector<1x1xf32>
    %175 = vector.broadcast %174 : vector<1x1xf32> to vector<4x32xf32>
    %176 = arith.subf %167, %175 : vector<4x32xf32>
    %177 = arith.mulf %176, %176 : vector<4x32xf32>
    %178 = vector.shape_cast %177 : vector<4x32xf32> to vector<1x4x32xf32>
    %cst_57 = arith.constant dense<0.000000e+00> : vector<1xf32>
    %179 = vector.multi_reduction <add>, %178, %cst_57 [1, 2] : vector<1x4x32xf32> to vector<1xf32>
    %180 = vector.shape_cast %179 : vector<1xf32> to vector<1x1x1xf32>
    %181 = vector.extract %180[0, 0, 0] : f32 from vector<1x1x1xf32>
    %182 = vector.broadcast %181 : f32 to vector<1x1xf32>
    %cst_58 = arith.constant 1.280000e+02 : f32
    %183 = vector.broadcast %cst_58 : f32 to vector<1x1xf32>
    %184 = arith.divf %182, %183 : vector<1x1xf32>
    %cst_59 = arith.constant 9.99999974E-6 : f32
    %185 = vector.broadcast %cst_59 : f32 to vector<1x1xf32>
    %186 = arith.addf %184, %185 : vector<1x1xf32>
    %187 = math.rsqrt %186 : vector<1x1xf32>
    %188 = vector.broadcast %187 : vector<1x1xf32> to vector<4x32xf32>
    %189 = arith.mulf %176, %188 : vector<4x32xf32>
    %190 = arith.addf %159, %189 : vector<4x32xf32>
    %c6 = arith.constant 6 : index
    %c0_60 = arith.constant 0 : index
    %c0_61 = arith.constant 0 : index
    %191 = vector.load %arg0[%c6, %c0_60, %c0_61] : memref<8x4x32xf32, #tpu.memory_space<vmem>>, vector<1x4x32xf32>
    %192 = vector.shape_cast %191 : vector<1x4x32xf32> to vector<4x32xf32>
    %cst_62 = arith.constant dense<0.000000e+00> : vector<4x32xf32>
    %193 = tpu.matmul %164, %0, %cst_62 {dimension_numbers = #tpu.dot_dimension_numbers<[1], [0], [0], [1], [0, 0, 1, 1], [], []>} : vector<4x32xf32>, vector<32x32xf32>, vector<4x32xf32> -> vector<4x32xf32>
    %194 = arith.addf %192, %193 : vector<4x32xf32>
    %195 = math.tanh %194 : vector<4x32xf32>
    %196 = tpu.concatenate %195, %167 in 1 : vector<4x32xf32>, vector<4x32xf32> -> vector<4x64xf32>
    %cst_63 = arith.constant dense<0.000000e+00> : vector<4x32xf32>
    %197 = tpu.matmul %196, %1, %cst_63 {dimension_numbers = #tpu.dot_dimension_numbers<[1], [0], [0], [1], [0, 0, 1, 1], [], []>} : vector<4x64xf32>, vector<64x32xf32>, vector<4x32xf32> -> vector<4x32xf32>
    %198 = math.tanh %197 : vector<4x32xf32>
    %199 = vector.shape_cast %198 : vector<4x32xf32> to vector<1x4x32xf32>
    %cst_64 = arith.constant dense<0.000000e+00> : vector<1xf32>
    %200 = vector.multi_reduction <add>, %199, %cst_64 [1, 2] : vector<1x4x32xf32> to vector<1xf32>
    %201 = vector.shape_cast %200 : vector<1xf32> to vector<1x1x1xf32>
    %202 = vector.extract %201[0, 0, 0] : f32 from vector<1x1x1xf32>
    %203 = vector.broadcast %202 : f32 to vector<1x1xf32>
    %cst_65 = arith.constant 1.280000e+02 : f32
    %204 = vector.broadcast %cst_65 : f32 to vector<1x1xf32>
    %205 = arith.divf %203, %204 : vector<1x1xf32>
    %206 = vector.broadcast %205 : vector<1x1xf32> to vector<4x32xf32>
    %207 = arith.subf %198, %206 : vector<4x32xf32>
    %208 = arith.mulf %207, %207 : vector<4x32xf32>
    %209 = vector.shape_cast %208 : vector<4x32xf32> to vector<1x4x32xf32>
    %cst_66 = arith.constant dense<0.000000e+00> : vector<1xf32>
    %210 = vector.multi_reduction <add>, %209, %cst_66 [1, 2] : vector<1x4x32xf32> to vector<1xf32>
    %211 = vector.shape_cast %210 : vector<1xf32> to vector<1x1x1xf32>
    %212 = vector.extract %211[0, 0, 0] : f32 from vector<1x1x1xf32>
    %213 = vector.broadcast %212 : f32 to vector<1x1xf32>
    %cst_67 = arith.constant 1.280000e+02 : f32
    %214 = vector.broadcast %cst_67 : f32 to vector<1x1xf32>
    %215 = arith.divf %213, %214 : vector<1x1xf32>
    %cst_68 = arith.constant 9.99999974E-6 : f32
    %216 = vector.broadcast %cst_68 : f32 to vector<1x1xf32>
    %217 = arith.addf %215, %216 : vector<1x1xf32>
    %218 = math.rsqrt %217 : vector<1x1xf32>
    %219 = vector.broadcast %218 : vector<1x1xf32> to vector<4x32xf32>
    %220 = arith.mulf %207, %219 : vector<4x32xf32>
    %221 = arith.addf %190, %220 : vector<4x32xf32>
    %c7 = arith.constant 7 : index
    %c0_69 = arith.constant 0 : index
    %c0_70 = arith.constant 0 : index
    %222 = vector.load %arg0[%c7, %c0_69, %c0_70] : memref<8x4x32xf32, #tpu.memory_space<vmem>>, vector<1x4x32xf32>
    %223 = vector.shape_cast %222 : vector<1x4x32xf32> to vector<4x32xf32>
    %cst_71 = arith.constant dense<0.000000e+00> : vector<4x32xf32>
    %224 = tpu.matmul %195, %0, %cst_71 {dimension_numbers = #tpu.dot_dimension_numbers<[1], [0], [0], [1], [0, 0, 1, 1], [], []>} : vector<4x32xf32>, vector<32x32xf32>, vector<4x32xf32> -> vector<4x32xf32>
    %225 = arith.addf %223, %224 : vector<4x32xf32>
    %226 = math.tanh %225 : vector<4x32xf32>
    %227 = tpu.concatenate %226, %198 in 1 : vector<4x32xf32>, vector<4x32xf32> -> vector<4x64xf32>
    %cst_72 = arith.constant dense<0.000000e+00> : vector<4x32xf32>
    %228 = tpu.matmul %227, %1, %cst_72 {dimension_numbers = #tpu.dot_dimension_numbers<[1], [0], [0], [1], [0, 0, 1, 1], [], []>} : vector<4x64xf32>, vector<64x32xf32>, vector<4x32xf32> -> vector<4x32xf32>
    %229 = math.tanh %228 : vector<4x32xf32>
    %230 = vector.shape_cast %229 : vector<4x32xf32> to vector<1x4x32xf32>
    %cst_73 = arith.constant dense<0.000000e+00> : vector<1xf32>
    %231 = vector.multi_reduction <add>, %230, %cst_73 [1, 2] : vector<1x4x32xf32> to vector<1xf32>
    %232 = vector.shape_cast %231 : vector<1xf32> to vector<1x1x1xf32>
    %233 = vector.extract %232[0, 0, 0] : f32 from vector<1x1x1xf32>
    %234 = vector.broadcast %233 : f32 to vector<1x1xf32>
    %cst_74 = arith.constant 1.280000e+02 : f32
    %235 = vector.broadcast %cst_74 : f32 to vector<1x1xf32>
    %236 = arith.divf %234, %235 : vector<1x1xf32>
    %237 = vector.broadcast %236 : vector<1x1xf32> to vector<4x32xf32>
    %238 = arith.subf %229, %237 : vector<4x32xf32>
    %239 = arith.mulf %238, %238 : vector<4x32xf32>
    %240 = vector.shape_cast %239 : vector<4x32xf32> to vector<1x4x32xf32>
    %cst_75 = arith.constant dense<0.000000e+00> : vector<1xf32>
    %241 = vector.multi_reduction <add>, %240, %cst_75 [1, 2] : vector<1x4x32xf32> to vector<1xf32>
    %242 = vector.shape_cast %241 : vector<1xf32> to vector<1x1x1xf32>
    %243 = vector.extract %242[0, 0, 0] : f32 from vector<1x1x1xf32>
    %244 = vector.broadcast %243 : f32 to vector<1x1xf32>
    %cst_76 = arith.constant 1.280000e+02 : f32
    %245 = vector.broadcast %cst_76 : f32 to vector<1x1xf32>
    %246 = arith.divf %244, %245 : vector<1x1xf32>
    %cst_77 = arith.constant 9.99999974E-6 : f32
    %247 = vector.broadcast %cst_77 : f32 to vector<1x1xf32>
    %248 = arith.addf %246, %247 : vector<1x1xf32>
    %249 = math.rsqrt %248 : vector<1x1xf32>
    %250 = vector.broadcast %249 : vector<1x1xf32> to vector<4x32xf32>
    %251 = arith.mulf %238, %250 : vector<4x32xf32>
    %252 = arith.addf %221, %251 : vector<4x32xf32>
    %cst_78 = arith.constant 1.250000e-01 : f32
    %253 = vector.broadcast %cst_78 : f32 to vector<4x32xf32>
    %254 = arith.mulf %252, %253 : vector<4x32xf32>
    %c0_79 = arith.constant 0 : index
    %c0_80 = arith.constant 0 : index
    %255 = vector.load %arg3[%c0_79, %c0_80] : memref<1x32xf32, #tpu.memory_space<vmem>>, vector<1x32xf32>
    %256 = vector.broadcast %255 : vector<1x32xf32> to vector<4x32xf32>
    %257 = arith.mulf %254, %256 : vector<4x32xf32>
    %cst_81 = arith.constant dense<0.000000e+00> : vector<4xf32>
    %258 = vector.multi_reduction <add>, %257, %cst_81 [1] : vector<4x32xf32> to vector<4xf32>
    %259 = vector.shape_cast %258 : vector<4xf32> to vector<4x1xf32>
    %c0_82 = arith.constant 0 : index
    %260 = memref.load %arg4[%c0_82] : memref<1xf32, #tpu.memory_space<smem>>
    %261 = vector.broadcast %260 : f32 to vector<4x1xf32>
    %262 = arith.addf %259, %261 : vector<4x1xf32>
    %263 = arith.negf %262 : vector<4x1xf32>
    %264 = math.exp %263 : vector<4x1xf32>
    %cst_83 = arith.constant 1.000000e+00 : f32
    %265 = vector.broadcast %cst_83 : f32 to vector<4x1xf32>
    %266 = arith.addf %265, %264 : vector<4x1xf32>
    %267 = arith.divf %265, %266 : vector<4x1xf32>
    %c0_84 = arith.constant 0 : index
    %c0_85 = arith.constant 0 : index
    %268 = vector.load %arg5[%c0_84, %c0_85] : memref<4x1xf32, #tpu.memory_space<vmem>>, vector<4x1xf32>
    tpu.vector_store %arg5[%c0_84, %c0_85], %267 {strides = array<i32>} : memref<4x1xf32, #tpu.memory_space<vmem>>, vector<4x1xf32>,
    return
  }
}

</mosaic_0001>

<bundles_post_ra>
// kernel: tpu_custom_call.1
= control target key start
LH: loop header
LB: loop body
LE: loop exit
PB: predicated region body
PF: predicated region fallthrough
CT: control target
= control target key end

     0   :  { %v2010_v0 = vmov 0.0   ;;  %vm2011_vm0 = vmmov 0   ;;  %vm34_vm1 = vcmask 261120   ;;  %vm111_vm2 = vcmask 523264   ;;  %s2012_s19 = smov 32   ;;  %s2467_s1 = inlined_call_operand.vmem [shape: f32[32,32], index: 1, kind: input, shape index: {}]   ;;  %s2468_s2 = inlined_call_operand.vmem [shape: f32[64,32], index: 2, kind: input, shape index: {}]   ;;  %s2469_s0 = inlined_call_operand.vmem [shape: f32[8,4,32], index: 0, kind: input, shape index: {}]   ;;  %s2470_s3 = inlined_call_operand.vmem [shape: f32[1,32], index: 3, kind: input, shape index: {}]   ;;  %s2471_s4 = inlined_call_operand.<no memory space> [shape: f32[1], index: 4, kind: input, shape index: {}]   ;;  %s2472_s5 = inlined_call_operand.vmem [shape: f32[4,1], index: 5, kind: output, shape index: {}]  }
   0x1   :  { %1683 = vmatprep.subr.mxu1 %v2010_v0  ;;  %v2047_v1 = vld [vmem:[%s2467_s1 + $0x18] sm:$0xff]  ;;  %v2052_v2 = vld [vmem:[%s2467_s1 + $0x10] sm:$0xff]  ;;  %1691 = vmatprep.mubr.msk.f32.mxu1 %vm2011_vm0, %v2010_v0  ;;  %v2062_v3 = vld [vmem:[%s2467_s1 + $0x8] sm:$0xff]  ;;  %vm186_vm3 = vcmask 257024   ;;  %vm1541_vm4 = vcmask 3072  }
   0x2   :  { %1684 = vmatpush3.msra.mxu1 %v2047_v1  ;;  %1713 = vmatprep.subr.mxu0 %v2010_v0  ;;  %v2071_v4 = vld [vmem:[%s2467_s1] sm:$0xff]  ;;  %v2091_v5 = vld [vmem:[%s2468_s2 + $0x38] sm:$0xff]  ;;  %v2097_v6 = vld [vmem:[%s2468_s2 + $0x30] sm:$0xff] }
   0x3   :  { %1685 = vmatprep.subr.mxu1 %v2010_v0  ;;  %1714 = vmatpush3.msra.mxu0 %v2047_v1  ;;  %v2103_v7 = vld [vmem:[%s2468_s2 + $0x28] sm:$0xff]  ;;  %v2110_v8 = vld [vmem:[%s2468_s2 + $0x20] sm:$0xff]  ;;  %v2117_v9 = vld [vmem:[%s2468_s2 + $0x18] sm:$0xff] }
   0x4   :  { %1686 = vmatpush3.msra.mxu1 %v2052_v2  ;;  %1715 = vmatprep.subr.mxu0 %v2010_v0  ;;  %v2124_v10 = vld [vmem:[%s2468_s2 + $0x10] sm:$0xff]  ;;  %v2131_v11 = vld [vmem:[%s2468_s2 + $0x8] sm:$0xff]  ;;  %v2138_v12 = vld [vmem:[%s2468_s2] sm:$0xff] }
   0x5   :  { %1687 = vmatprep.subr.mxu1 %v2010_v0  ;;  %1716 = vmatpush3.msra.mxu0 %v2052_v2  ;;  %v33_v13 = vld [vmem:[%s2469_s0] sm:$0xf]  ;;  %v1548_v19 = vld [vmem:[%s2469_s0 + $0x4] sm:$0xf]  ;;  %v1551_v29 = vld [vmem:[%s2469_s0 + $0x8] sm:$0xf] }
   0x6   :  { %1688 = vmatpush3.msra.mxu1 %v2062_v3  ;;  %1717 = vmatprep.subr.mxu0 %v2010_v0  ;;  %v1554_v41 = vld [vmem:[%s2469_s0 + $0xc] sm:$0xf]  ;;  %v1557_v58 = vld [vmem:[%s2469_s0 + $0x10] sm:$0xf] }
   0x7   :  { %1689 = vmatprep.subr.mxu1 %v2010_v0  ;;  %1718 = vmatpush3.msra.mxu0 %v2062_v3 }
   0x8   :  { %1690 = vmatpush3.msra.mxu1 %v2071_v4  ;;  %1719 = vmatprep.subr.mxu0 %v2010_v0 }
   0x9   :  { %1692 = vmatmul.mubr.f32.vlgmr.msra.gmra.mxu1 %v2010_v0  ;;  %1694 = vmatprep.subr.mxu1 %v2010_v0 }
   0xa   :  { %1720 = vmatpush3.msra.mxu0 %v2071_v4  ;;  %1721 = vmatprep.mubr.msk.f32.mxu0 %vm2011_vm0, %v2010_v0 }
   0xb   :  { %1710 = vmatprep.mubr.msk.f32.mxu1 %vm2011_vm0, %v2010_v0  ;;  %1724 = vmatprep.subr.mxu0 %v2010_v0 }
   0xc   :  { %1695 = vmatpush3.msra.mxu1 %v2091_v5 }
   0xd   :  { %1696 = vmatprep.subr.mxu1 %v2010_v0 }
   0xe   :  { %1697 = vmatpush3.msra.mxu1 %v2097_v6 }
   0xf   :  { %1698 = vmatprep.subr.mxu1 %v2010_v0 }
  0x10   :  { %1699 = vmatpush3.msra.mxu1 %v2103_v7 }
  0x11   :  { %1700 = vmatprep.subr.mxu1 %v2010_v0 }
  0x12   :  { %1701 = vmatpush3.msra.mxu1 %v2110_v8 }
  0x13   :  { %1702 = vmatprep.subr.mxu1 %v2010_v0 }
  0x14   :  { %1703 = vmatpush3.msra.mxu1 %v2117_v9 }
  0x15   :  { %1704 = vmatprep.subr.mxu1 %v2010_v0 }
  0x16   :  { %1705 = vmatpush3.msra.mxu1 %v2124_v10 }
  0x17   :  { %1706 = vmatprep.subr.mxu1 %v2010_v0 }
  0x18   :  { %1707 = vmatpush3.msra.mxu1 %v2131_v11 }
  0x19   :  { %1708 = vmatprep.subr.mxu1 %v2010_v0 }
  0x1a   :  { %1709 = vmatpush3.msra.mxu1 %v2138_v12 }
  0x1b   :  { %1743 = vmatprep.subr.mxu1 %v2010_v0 }
  0xc9   :  { %v104_v14 = vpop.f32.mrf.mxu1 }
  0xca   :  { %v108_v15 = vadd.f32 %v104_v14, %v33_v13 }
  0xcb   :  { %v1693_v16 = vpop.f32.mrf.mxu1 }
  0xcc   :  { %1958 = vtanh.f32 %v108_v15 }
  0xd9   :  { %v1959_v17 = vpop.eup %1958 }
  0xda   :  { %1722 = vmatmul.mubr.msk.f32.vlgmr.msra.gmra.mxu0 %vm34_vm1, %v1959_v17  ;;  %v110_v18 = vsel %vm34_vm1, %v1959_v17, 0.0 }
  0xdb   :  { %1711 = vmatmul.mubr.msk.f32.vlgmr.msra.gmra.mxu1 %vm111_vm2, %v110_v18  ;;  %1725 = vmatpush3.msra.mxu0 %v2091_v5 }
  0xdc   :  { %1744 = vmatpush3.msra.mxu1 %v2047_v1  ;;  %1751 = vmatprep.mubr.msk.f32.mxu1 %vm2011_vm0, %v2010_v0 }
  0xdd   :  { %1745 = vmatprep.subr.mxu1 %v2010_v0  ;;  %1726 = vmatprep.subr.mxu0 %v2010_v0 }
  0xde   :  { %1746 = vmatpush3.msra.mxu1 %v2052_v2  ;;  %1727 = vmatpush3.msra.mxu0 %v2097_v6 }
  0xdf   :  { %1747 = vmatprep.subr.mxu1 %v2010_v0  ;;  %1728 = vmatprep.subr.mxu0 %v2010_v0 }
  0xe0   :  { %1748 = vmatpush3.msra.mxu1 %v2062_v3  ;;  %1729 = vmatpush3.msra.mxu0 %v2103_v7 }
  0xe1   :  { %1749 = vmatprep.subr.mxu1 %v2010_v0  ;;  %1730 = vmatprep.subr.mxu0 %v2010_v0 }
  0xe2   :  { %1750 = vmatpush3.msra.mxu1 %v2071_v4  ;;  %1731 = vmatpush3.msra.mxu0 %v2110_v8 }
  0xe3   :  { %1732 = vmatprep.subr.mxu0 %v2010_v0  ;;  %1740 = vmatprep.mubr.msk.f32.mxu0 %vm2011_vm0, %v2010_v0 }
  0xe4   :  { %1733 = vmatpush3.msra.mxu0 %v2117_v9  ;;  %1754 = vmatprep.subr.mxu1 %v2010_v0 }
  0xe5   :  { %1734 = vmatprep.subr.mxu0 %v2010_v0 }
  0xe6   :  { %1735 = vmatpush3.msra.mxu0 %v2124_v10 }
  0xe7   :  { %1736 = vmatprep.subr.mxu0 %v2010_v0 }
  0xe8   :  { %1737 = vmatpush3.msra.mxu0 %v2131_v11 }
  0xe9   :  { %1738 = vmatprep.subr.mxu0 %v2010_v0 }
  0xea   :  { %1739 = vmatpush3.msra.mxu0 %v2138_v12 }
  0xeb   :  { %1773 = vmatprep.subr.mxu0 %v2010_v0 }
 0x19a   :  { %v289_v20 = vpop.f32.mrf.mxu0 }
 0x19b   :  { %v293_v21 = vadd.f32 %v1548_v19, %v289_v20  ;;  %v181_v22 = vpop.f32.mrf.mxu1 }
 0x19c   :  { %1960 = vtanh.f32 %v181_v22  ;;  %v1723_v23 = vpop.f32.mrf.mxu0  ;;  %v1560_v22 = vld [vmem:[%s2469_s0 + $0x14] sm:$0xf] }
 0x19d   :  { %1962 = vtanh.f32 %v293_v21  ;;  %v1712_v24 = vpop.f32.mrf.mxu1 }
 0x1a9   :  { %v2181_v25 = vpop.eup %1960 }
 0x1aa   :  { %v1963_v26 = vpop.eup %1962  ;;  %296 = vrot.lane.b32.xlu0 %v2181_v25, %s2012_s19  ;;  %v187_v37 = vsel %vm186_vm3, %v2181_v25, 0.0 }
 0x1ab   :  { %1752 = vmatmul.mubr.msk.f32.vlgmr.msra.gmra.mxu1 %vm34_vm1, %v1963_v26 }
 0x1ac   :  { %1755 = vmatpush3.msra.mxu1 %v2091_v5  ;;  %1770 = vmatprep.mubr.msk.f32.mxu1 %vm2011_vm0, %v2010_v0 }
 0x1ad   :  { %1756 = vmatprep.subr.mxu1 %v2010_v0 }
 0x1ae   :  { %1757 = vmatpush3.msra.mxu1 %v2097_v6 }
 0x1af   :  { %1758 = vmatprep.subr.mxu1 %v2010_v0 }
 0x1b0   :  { %1759 = vmatpush3.msra.mxu1 %v2103_v7 }
 0x1b1   :  { %1760 = vmatprep.subr.mxu1 %v2010_v0 }
 0x1b2   :  { %1761 = vmatpush3.msra.mxu1 %v2110_v8 }
 0x1b3   :  { %1762 = vmatprep.subr.mxu1 %v2010_v0 }
 0x1b4   :  { %1763 = vmatpush3.msra.mxu1 %v2117_v9 }
 0x1b5   :  { %1764 = vmatprep.subr.mxu1 %v2010_v0 }
 0x1b6   :  { %1765 = vmatpush3.msra.mxu1 %v2124_v10 }
 0x1b7   :  { %1766 = vmatprep.subr.mxu1 %v2010_v0 }
 0x1b8   :  { %1767 = vmatpush3.msra.mxu1 %v2131_v11 }
 0x1b9   :  { %1768 = vmatprep.subr.mxu1 %v2010_v0 }
 0x1ba   :  { %1769 = vmatpush3.msra.mxu1 %v2138_v12 }
 0x1bb   :  { %1803 = vmatprep.subr.mxu1 %v2010_v0 }
 0x21c   :  { %v297_v27 = vpop.permute.xlu0 %296 }
 0x21d   :  { %v299_v28 = vsel %vm34_vm1, %v1963_v26, %v297_v27 }
 0x21e   :  { %1741 = vmatmul.mubr.msk.f32.vlgmr.msra.gmra.mxu0 %vm111_vm2, %v299_v28 }
 0x21f   :  { %1774 = vmatpush3.msra.mxu0 %v2047_v1  ;;  %1781 = vmatprep.mubr.msk.f32.mxu0 %vm2011_vm0, %v2010_v0 }
 0x220   :  { %1775 = vmatprep.subr.mxu0 %v2010_v0 }
 0x221   :  { %1776 = vmatpush3.msra.mxu0 %v2052_v2 }
 0x222   :  { %1777 = vmatprep.subr.mxu0 %v2010_v0 }
 0x223   :  { %1778 = vmatpush3.msra.mxu0 %v2062_v3 }
 0x224   :  { %1779 = vmatprep.subr.mxu0 %v2010_v0 }
 0x225   :  { %1780 = vmatpush3.msra.mxu0 %v2071_v4 }
 0x226   :  { %1784 = vmatprep.subr.mxu0 %v2010_v0 }
 0x26b   :  { %v475_v30 = vpop.f32.mrf.mxu1 }
 0x26c   :  { %v479_v31 = vadd.f32 %v1551_v29, %v475_v30 }
 0x26d   :  { %v1753_v32 = vpop.f32.mrf.mxu1 }
 0x26e   :  { %1964 = vtanh.f32 %v479_v31 }
 0x27b   :  { %v1965_v33 = vpop.eup %1964 }
 0x27c   :  { %1782 = vmatmul.mubr.msk.f32.vlgmr.msra.gmra.mxu0 %vm34_vm1, %v1965_v33 }
 0x27d   :  { %1785 = vmatpush3.msra.mxu0 %v2091_v5  ;;  %1800 = vmatprep.mubr.msk.f32.mxu0 %vm2011_vm0, %v2010_v0 }
 0x27e   :  { %1786 = vmatprep.subr.mxu0 %v2010_v0 }
 0x27f   :  { %1787 = vmatpush3.msra.mxu0 %v2097_v6 }
 0x280   :  { %1788 = vmatprep.subr.mxu0 %v2010_v0 }
 0x281   :  { %1789 = vmatpush3.msra.mxu0 %v2103_v7 }
 0x282   :  { %1790 = vmatprep.subr.mxu0 %v2010_v0 }
 0x283   :  { %1791 = vmatpush3.msra.mxu0 %v2110_v8 }
 0x284   :  { %1792 = vmatprep.subr.mxu0 %v2010_v0 }
 0x285   :  { %1793 = vmatpush3.msra.mxu0 %v2117_v9 }
 0x286   :  { %1794 = vmatprep.subr.mxu0 %v2010_v0 }
 0x287   :  { %1795 = vmatpush3.msra.mxu0 %v2124_v10 }
 0x288   :  { %1796 = vmatprep.subr.mxu0 %v2010_v0 }
 0x289   :  { %1797 = vmatpush3.msra.mxu0 %v2131_v11 }
 0x28a   :  { %1798 = vmatprep.subr.mxu0 %v2010_v0 }
 0x28b   :  { %1799 = vmatpush3.msra.mxu0 %v2138_v12 }
 0x28c   :  { %1833 = vmatprep.subr.mxu0 %v2010_v0 }
 0x2de   :  { %v369_v34 = vpop.f32.mrf.mxu0 }
 0x2df   :  { %1966 = vtanh.f32 %v369_v34 }
 0x2e0   :  { %v1742_v35 = vpop.f32.mrf.mxu0 }
 0x2ec   :  { %v2238_v36 = vpop.eup %1966 }
 0x2ed   :  { %482 = vrot.lane.b32.xlu0 %v2238_v36, %s2012_s19  ;;  %v374_v38 = vsel %vm186_vm3, %v2238_v36, 0.0 }
 0x30c   :  { %188 = vadd.xlane.f32.xlu0 %v187_v37 }
 0x310   :  { %375 = vadd.xlane.f32.xlu0 %v374_v38 }
 0x33c   :  { %v661_v39 = vpop.f32.mrf.mxu0 }
 0x33d   :  { %v665_v42 = vadd.f32 %v1554_v41, %v661_v39 }
 0x33e   :  { %v1783_v40 = vpop.f32.mrf.mxu0 }
 0x33f   :  { %1968 = vtanh.f32 %v665_v42 }
 0x34c   :  { %v1969_v45 = vpop.eup %1968 }
 0x35f   :  { %v483_v43 = vpop.permute.xlu0 %482 }
 0x360   :  { %v485_v44 = vsel %vm34_vm1, %v1965_v33, %v483_v43 }
 0x361   :  { %1771 = vmatmul.mubr.msk.f32.vlgmr.msra.gmra.mxu1 %vm111_vm2, %v485_v44 }
 0x362   :  { %1804 = vmatpush3.msra.mxu1 %v2047_v1  ;;  %1811 = vmatprep.mubr.msk.f32.mxu1 %vm2011_vm0, %v2010_v0 }
 0x363   :  { %1805 = vmatprep.subr.mxu1 %v2010_v0 }
 0x364   :  { %1806 = vmatpush3.msra.mxu1 %v2052_v2 }
 0x365   :  { %1807 = vmatprep.subr.mxu1 %v2010_v0 }
 0x366   :  { %1808 = vmatpush3.msra.mxu1 %v2062_v3 }
 0x367   :  { %1809 = vmatprep.subr.mxu1 %v2010_v0 }
 0x368   :  { %1810 = vmatpush3.msra.mxu1 %v2071_v4 }
 0x369   :  { %1812 = vmatmul.mubr.msk.f32.vlgmr.msra.gmra.mxu1 %vm34_vm1, %v1969_v45  ;;  %1814 = vmatprep.subr.mxu1 %v2010_v0 }
 0x36a   :  { %1815 = vmatpush3.msra.mxu1 %v2091_v5  ;;  %1830 = vmatprep.mubr.msk.f32.mxu1 %vm2011_vm0, %v2010_v0 }
 0x36b   :  { %1816 = vmatprep.subr.mxu1 %v2010_v0 }
 0x36c   :  { %1817 = vmatpush3.msra.mxu1 %v2097_v6 }
 0x36d   :  { %1818 = vmatprep.subr.mxu1 %v2010_v0 }
 0x36e   :  { %1819 = vmatpush3.msra.mxu1 %v2103_v7 }
 0x36f   :  { %1820 = vmatprep.subr.mxu1 %v2010_v0 }
 0x370   :  { %1821 = vmatpush3.msra.mxu1 %v2110_v8 }
 0x371   :  { %1822 = vmatprep.subr.mxu1 %v2010_v0 }
 0x372   :  { %1823 = vmatpush3.msra.mxu1 %v2117_v9 }
 0x373   :  { %1824 = vmatprep.subr.mxu1 %v2010_v0 }
 0x374   :  { %1825 = vmatpush3.msra.mxu1 %v2124_v10 }
 0x375   :  { %1826 = vmatprep.subr.mxu1 %v2010_v0 }
 0x376   :  { %1827 = vmatpush3.msra.mxu1 %v2131_v11 }
 0x377   :  { %1828 = vmatprep.subr.mxu1 %v2010_v0 }
 0x378   :  { %1829 = vmatpush3.msra.mxu1 %v2138_v12 }
 0x379   :  { %1863 = vmatprep.subr.mxu1 %v2010_v0 }
 0x395   :  { %v189_v46 = vpop.xlane.xlu0 %188 }
 0x396   :  { %v190_v47 = vrot.slane %v189_v46, 4 }
 0x398   :  { %v191_v48 = vadd.f32 %v190_v47, %v189_v46 }
 0x399   :  { %v376_v27 = vpop.xlane.xlu0 %375 }
 0x39a   :  { %v192_v49 = vrot.slane %v191_v48, 2  ;;  %v377_v28 = vrot.slane %v376_v27, 4 }
 0x39c   :  { %v193_v50 = vadd.f32 %v192_v49, %v191_v48  ;;  %v378_v29 = vadd.f32 %v377_v28, %v376_v27 }
 0x39e   :  { %v194_v51 = vrot.slane %v193_v50, 1  ;;  %v379_v30 = vrot.slane %v378_v29, 2 }
 0x3a0   :  { %v195_v52 = vadd.f32 %v194_v51, %v193_v50  ;;  %v380_v34 = vadd.f32 %v379_v30, %v378_v29 }
 0x3a2   :  { %1923 = vpush %v195_v52  ;;  %v381_v38 = vrot.slane %v380_v34, 1 }
 0x3a4   :  { %v382_v41 = vadd.f32 %v381_v38, %v380_v34 }
 0x3d3   :  { %s1924_s1 = spop %1923 }
 0x3d4   :  { %v197_v17 = vstv %s1924_s1 }
 0x3d5   :  { %v199_v18 = vmul.f32 0.0078125, %v197_v17  ;;  %v1563_v17 = vld [vmem:[%s2469_s0 + $0x18] sm:$0xf] }
 0x3d7   :  { %v2323_v19 = vsub.f32 %v2181_v25, %v199_v18 }
 0x3d9   :  { %v201_v20 = vmul.f32 %v2323_v19, %v2323_v19 }
 0x3db   :  { %v202_v21 = vsel %vm186_vm3, %v201_v20, 0.0 }
 0x421   :  { %v555_v53 = vpop.f32.mrf.mxu1 }
 0x422   :  { %1970 = vtanh.f32 %v555_v53 }
 0x423   :  { %v1772_v54 = vpop.f32.mrf.mxu1 }
 0x429   :  { %v847_v55 = vpop.f32.mrf.mxu1 }
 0x42a   :  { %v851_v59 = vadd.f32 %v1557_v58, %v847_v55 }
 0x42b   :  { %v1813_v56 = vpop.f32.mrf.mxu1 }
 0x42c   :  { %1972 = vtanh.f32 %v851_v59 }
 0x42f   :  { %v2280_v57 = vpop.eup %1970 }
 0x430   :  { %668 = vrot.lane.b32.xlu1 %v2280_v57, %s2012_s19  ;;  %v560_v47 = vsel %vm186_vm3, %v2280_v57, 0.0 }
 0x439   :  { %v1973_v62 = vpop.eup %1972 }
 0x4a2   :  { %v669_v60 = vpop.permute.xlu1 %668 }
 0x4a3   :  { %v671_v61 = vsel %vm34_vm1, %v1969_v45, %v669_v60 }
 0x4a4   :  { %1801 = vmatmul.mubr.msk.f32.vlgmr.msra.gmra.mxu0 %vm111_vm2, %v671_v61 }
 0x4a5   :  { %1834 = vmatpush3.msra.mxu0 %v2047_v1  ;;  %1841 = vmatprep.mubr.msk.f32.mxu0 %vm2011_vm0, %v2010_v0 }
 0x4a6   :  { %1835 = vmatprep.subr.mxu0 %v2010_v0 }
 0x4a7   :  { %1836 = vmatpush3.msra.mxu0 %v2052_v2 }
 0x4a8   :  { %1837 = vmatprep.subr.mxu0 %v2010_v0 }
 0x4a9   :  { %1838 = vmatpush3.msra.mxu0 %v2062_v3 }
 0x4aa   :  { %1839 = vmatprep.subr.mxu0 %v2010_v0 }
 0x4ab   :  { %1840 = vmatpush3.msra.mxu0 %v2071_v4 }
 0x4ac   :  { %1842 = vmatmul.mubr.msk.f32.vlgmr.msra.gmra.mxu0 %vm34_vm1, %v1973_v62  ;;  %1844 = vmatprep.subr.mxu0 %v2010_v0 }
 0x4ad   :  { %1845 = vmatpush3.msra.mxu0 %v2091_v5  ;;  %1860 = vmatprep.mubr.msk.f32.mxu0 %vm2011_vm0, %v2010_v0 }
 0x4ae   :  { %1846 = vmatprep.subr.mxu0 %v2010_v0 }
 0x4af   :  { %1847 = vmatpush3.msra.mxu0 %v2097_v6 }
 0x4b0   :  { %1848 = vmatprep.subr.mxu0 %v2010_v0 }
 0x4b1   :  { %1849 = vmatpush3.msra.mxu0 %v2103_v7 }
 0x4b2   :  { %1850 = vmatprep.subr.mxu0 %v2010_v0 }
 0x4b3   :  { %1851 = vmatpush3.msra.mxu0 %v2110_v8 }
 0x4b4   :  { %1852 = vmatprep.subr.mxu0 %v2010_v0 }
 0x4b5   :  { %1853 = vmatpush3.msra.mxu0 %v2117_v9 }
 0x4b6   :  { %1854 = vmatprep.subr.mxu0 %v2010_v0 }
 0x4b7   :  { %1855 = vmatpush3.msra.mxu0 %v2124_v10 }
 0x4b8   :  { %1856 = vmatprep.subr.mxu0 %v2010_v0 }
 0x4b9   :  { %1857 = vmatpush3.msra.mxu0 %v2131_v11 }
 0x4ba   :  { %1858 = vmatprep.subr.mxu0 %v2010_v0 }
 0x4bb   :  { %1859 = vmatpush3.msra.mxu0 %v2138_v12 }
 0x4bc   :  { %1893 = vmatprep.subr.mxu0 %v2010_v0 }
 0x564   :  { %v741_v63 = vpop.f32.mrf.mxu0 }
 0x565   :  { %1974 = vtanh.f32 %v741_v63 }
 0x566   :  { %v1802_v13 = vpop.f32.mrf.mxu0 }
 0x56c   :  { %v1033_v14 = vpop.f32.mrf.mxu0 }
 0x56d   :  { %v1037_v23 = vadd.f32 %v1560_v22, %v1033_v14 }
 0x56e   :  { %v1843_v15 = vpop.f32.mrf.mxu0 }
 0x56f   :  { %1976 = vtanh.f32 %v1037_v23 }
 0x572   :  { %v2318_v16 = vpop.eup %1974 }
 0x573   :  { %854 = vrot.lane.b32.xlu1 %v2318_v16, %s2012_s19 }
 0x57c   :  { %v2341_v25 = vpop.eup %1976 }
 0x597   :  { %203 = vadd.xlane.f32.xlu1 %v202_v21 }
 0x5e5   :  { %v855_v24 = vpop.permute.xlu1 %854 }
 0x5e6   :  { %v857_v26 = vsel %vm34_vm1, %v1973_v62, %v855_v24 }
 0x5e7   :  { %1831 = vmatmul.mubr.msk.f32.vlgmr.msra.gmra.mxu1 %vm111_vm2, %v857_v26 }
 0x5e8   :  { %1864 = vmatpush3.msra.mxu1 %v2047_v1  ;;  %1871 = vmatprep.mubr.msk.f32.mxu1 %vm2011_vm0, %v2010_v0 }
 0x5e9   :  { %1865 = vmatprep.subr.mxu1 %v2010_v0 }
 0x5ea   :  { %1866 = vmatpush3.msra.mxu1 %v2052_v2 }
 0x5eb   :  { %1867 = vmatprep.subr.mxu1 %v2010_v0 }
 0x5ec   :  { %1868 = vmatpush3.msra.mxu1 %v2062_v3 }
 0x5ed   :  { %1869 = vmatprep.subr.mxu1 %v2010_v0 }
 0x5ee   :  { %1870 = vmatpush3.msra.mxu1 %v2071_v4 }
 0x5ef   :  { %1872 = vmatmul.mubr.msk.f32.vlgmr.msra.gmra.mxu1 %vm34_vm1, %v2341_v25  ;;  %1874 = vmatprep.subr.mxu1 %v2010_v0 }
 0x5f0   :  { %1875 = vmatpush3.msra.mxu1 %v2091_v5  ;;  %1890 = vmatprep.mubr.msk.f32.mxu1 %vm2011_vm0, %v2010_v0 }
 0x5f1   :  { %1876 = vmatprep.subr.mxu1 %v2010_v0 }
 0x5f2   :  { %1877 = vmatpush3.msra.mxu1 %v2097_v6 }
 0x5f3   :  { %1878 = vmatprep.subr.mxu1 %v2010_v0 }
 0x5f4   :  { %1879 = vmatpush3.msra.mxu1 %v2103_v7 }
 0x5f5   :  { %1880 = vmatprep.subr.mxu1 %v2010_v0 }
 0x5f6   :  { %1881 = vmatpush3.msra.mxu1 %v2110_v8 }
 0x5f7   :  { %1882 = vmatprep.subr.mxu1 %v2010_v0 }
 0x5f8   :  { %1883 = vmatpush3.msra.mxu1 %v2117_v9 }
 0x5f9   :  { %1884 = vmatprep.subr.mxu1 %v2010_v0 }
 0x5fa   :  { %1885 = vmatpush3.msra.mxu1 %v2124_v10 }
 0x5fb   :  { %1886 = vmatprep.subr.mxu1 %v2010_v0 }
 0x5fc   :  { %1887 = vmatpush3.msra.mxu1 %v2131_v11 }
 0x5fd   :  { %1888 = vmatprep.subr.mxu1 %v2010_v0 }
 0x5fe   :  { %1889 = vmatpush3.msra.mxu1 %v2138_v12 }
 0x620   :  { %v204_v31 = vpop.xlane.xlu1 %203 }
 0x621   :  { %v205_v32 = vrot.slane %v204_v31, 4 }
 0x623   :  { %v206_v33 = vadd.f32 %v205_v32, %v204_v31 }
 0x625   :  { %v207_v35 = vrot.slane %v206_v33, 2 }
 0x627   :  { %v208_v37 = vadd.f32 %v207_v35, %v206_v33 }
 0x629   :  { %v209_v39 = vrot.slane %v208_v37, 1 }
 0x62b   :  { %v210_v40 = vadd.f32 %v209_v39, %v208_v37 }
 0x62d   :  { %1925 = vpush %v210_v40 }
 0x62e   :  { %1927 = vpush %v382_v41 }
 0x65e   :  { %s2364_s28 = spop %1925 }
 0x65f   :  { %s1928_s29 = spop %1927  ;;  %v212_v20 = vstv %s2364_s28 }
 0x660   :  { %v384_v42 = vstv %s1928_s29  ;;  %v213_v23 = vmul.f32 0.0078125, %v212_v20 }
 0x661   :  { %v385_v43 = vmul.f32 0.0078125, %v384_v42 }
 0x662   :  { %v214_v24 = vadd.f32 1e-05, %v213_v23 }
 0x663   :  { %v2367_v44 = vsub.f32 %v2238_v36, %v385_v43 }
 0x665   :  { %v387_v45 = vmul.f32 %v2367_v44, %v2367_v44 }
 0x667   :  { %v388_v46 = vsel %vm186_vm3, %v387_v45, 0.0 }
 0x668   :  { %389 = vadd.xlane.f32.xlu1 %v388_v46 }
 0x66c   :  { %561 = vadd.xlane.f32.xlu1 %v560_v47 }
 0x6a7   :  { %v927_v48 = vpop.f32.mrf.mxu1 }
 0x6a8   :  { %1978 = vtanh.f32 %v927_v48 }
 0x6a9   :  { %v1832_v49 = vpop.f32.mrf.mxu1 }
 0x6af   :  { %v1219_v50 = vpop.f32.mrf.mxu1 }
 0x6b0   :  { %v1223_v18 = vadd.f32 %v1563_v17, %v1219_v50 }
 0x6b1   :  { %v1873_v51 = vpop.f32.mrf.mxu1 }
 0x6b2   :  { %1980 = vtanh.f32 %v1223_v18 }
 0x6b3   :  { %1982 = vrsqrt.f32 %v214_v24 }
 0x6b5   :  { %v2374_v52 = vpop.eup %1978 }
 0x6b6   :  { %1040 = vrot.lane.b32.xlu0 %v2374_v52, %s2012_s19 }
 0x6f1   :  { %v390_v36 = vpop.xlane.xlu1 %389 }
 0x6f2   :  { %v391_v53 = vrot.slane %v390_v36, 4 }
 0x6f4   :  { %v392_v54 = vadd.f32 %v391_v53, %v390_v36 }
 0x6f5   :  { %v562_v55 = vpop.xlane.xlu1 %561 }
 0x6f6   :  { %v393_v56 = vrot.slane %v392_v54, 2  ;;  %v563_v58 = vrot.slane %v562_v55, 4 }
 0x6f8   :  { %v564_v59 = vadd.f32 %v563_v58, %v562_v55  ;;  %v394_v60 = vadd.f32 %v393_v56, %v392_v54  ;;  %v932_v56 = vsel %vm186_vm3, %v2374_v52, 0.0 }
 0x6fa   :  { %v565_v61 = vrot.slane %v564_v59, 2  ;;  %v395_v62 = vrot.slane %v394_v60, 1 }
 0x6fc   :  { %v396_v63 = vadd.f32 %v395_v62, %v394_v60  ;;  %v566_v13 = vadd.f32 %v565_v61, %v564_v59 }
 0x6fe   :  { %1929 = vpush %v396_v63  ;;  %v567_v14 = vrot.slane %v566_v13, 1 }
 0x700   :  { %v568_v15 = vadd.f32 %v567_v14, %v566_v13 }
 0x702   :  { %1931 = vpush %v568_v15 }
 0x728   :  { %v1041_v21 = vpop.permute.xlu0 %1040 }
 0x729   :  { %v1043_v22 = vsel %vm34_vm1, %v2341_v25, %v1041_v21  ;;  %v2393_v25 = vpop.eup %1980 }
 0x72a   :  { %1861 = vmatmul.mubr.msk.f32.vlgmr.msra.gmra.mxu0 %vm111_vm2, %v1043_v22 }
 0x72b   :  { %1894 = vmatpush3.msra.mxu0 %v2047_v1  ;;  %1901 = vmatprep.mubr.msk.f32.mxu0 %vm2011_vm0, %v2010_v0 }
 0x72c   :  { %1895 = vmatprep.subr.mxu0 %v2010_v0 }
 0x72d   :  { %1896 = vmatpush3.msra.mxu0 %v2052_v2 }
 0x72e   :  { %1897 = vmatprep.subr.mxu0 %v2010_v0 }
 0x72f   :  { %s1930_s7 = spop %1929  ;;  %1898 = vmatpush3.msra.mxu0 %v2062_v3 }
 0x730   :  { %v398_v26 = vstv %s1930_s7  ;;  %1899 = vmatprep.subr.mxu0 %v2010_v0 }
 0x731   :  { %v399_v27 = vmul.f32 0.0078125, %v398_v26  ;;  %1900 = vmatpush3.msra.mxu0 %v2071_v4 }
 0x732   :  { %1902 = vmatmul.mubr.msk.f32.vlgmr.msra.gmra.mxu0 %vm34_vm1, %v2393_v25  ;;  %1904 = vmatprep.subr.mxu0 %v2010_v0 }
 0x733   :  { %v400_v1 = vadd.f32 1e-05, %v399_v27  ;;  %s1932_s8 = spop %1931  ;;  %1905 = vmatpush3.msra.mxu0 %v2091_v5  ;;  %1920 = vmatprep.mubr.msk.f32.mxu0 %vm2011_vm0, %v2010_v0 }
 0x734   :  { %v570_v2 = vstv %s1932_s8  ;;  %1906 = vmatprep.subr.mxu0 %v2010_v0 }
 0x735   :  { %1984 = vrsqrt.f32 %v400_v1  ;;  %v571_v3 = vmul.f32 0.0078125, %v570_v2  ;;  %1907 = vmatpush3.msra.mxu0 %v2097_v6  ;;  %v746_v6 = vsel %vm186_vm3, %v2318_v16, 0.0 }
 0x736   :  { %1908 = vmatprep.subr.mxu0 %v2010_v0 }
 0x737   :  { %v572_v4 = vsub.f32 %v2280_v57, %v571_v3  ;;  %1909 = vmatpush3.msra.mxu0 %v2103_v7  ;;  %v1983_v7 = vpop.eup %1982 }
 0x738   :  { %1910 = vmatprep.subr.mxu0 %v2010_v0 }
 0x739   :  { %v573_v28 = vmul.f32 %v572_v4, %v572_v4  ;;  %1911 = vmatpush3.msra.mxu0 %v2110_v8 }
 0x73a   :  { %1912 = vmatprep.subr.mxu0 %v2010_v0 }
 0x73b   :  { %v574_v5 = vsel %vm186_vm3, %v573_v28, 0.0  ;;  %1913 = vmatpush3.msra.mxu0 %v2117_v9  ;;  %v216_v9 = vmul.f32 %v1983_v7, %v2323_v19 }
 0x73c   :  { %575 = vadd.xlane.f32.xlu1 %v574_v5  ;;  %1914 = vmatprep.subr.mxu0 %v2010_v0 }
 0x73d   :  { %1915 = vmatpush3.msra.mxu0 %v2124_v10 }
 0x73e   :  { %1916 = vmatprep.subr.mxu0 %v2010_v0 }
 0x73f   :  { %1917 = vmatpush3.msra.mxu0 %v2131_v11 }
 0x740   :  { %747 = vadd.xlane.f32.xlu1 %v746_v6  ;;  %1918 = vmatprep.subr.mxu0 %v2010_v0 }
 0x741   :  { %1919 = vmatpush3.msra.mxu0 %v2138_v12 }
 0x742   :  { %v1985_v8 = vpop.eup %1984 }
 0x743   :  { %v402_v57 = vmul.f32 %v1985_v8, %v2367_v44 }
 0x745   :  { %v403_v29 = vadd.f32 %v402_v57, %v216_v9 }
 0x7c5   :  { %v576_v10 = vpop.xlane.xlu1 %575 }
 0x7c6   :  { %v577_v30 = vrot.slane %v576_v10, 4 }
 0x7c8   :  { %v578_v31 = vadd.f32 %v577_v30, %v576_v10 }
 0x7c9   :  { %v748_v32 = vpop.xlane.xlu1 %747 }
 0x7ca   :  { %v579_v33 = vrot.slane %v578_v31, 2  ;;  %v749_v34 = vrot.slane %v748_v32, 4 }
 0x7cc   :  { %v750_v35 = vadd.f32 %v749_v34, %v748_v32  ;;  %v580_v11 = vadd.f32 %v579_v33, %v578_v31 }
 0x7ce   :  { %v751_v37 = vrot.slane %v750_v35, 2  ;;  %v581_v38 = vrot.slane %v580_v11, 1 }
 0x7d0   :  { %v582_v39 = vadd.f32 %v581_v38, %v580_v11  ;;  %v752_v0 = vadd.f32 %v751_v37, %v750_v35 }
 0x7d2   :  { %1933 = vpush %v582_v39  ;;  %v753_v12 = vrot.slane %v752_v0, 1 }
 0x7d4   :  { %v754_v40 = vadd.f32 %v753_v12, %v752_v0  ;;  %v1566_v12 = vld [vmem:[%s2469_s0 + $0x1c] sm:$0xf] }
 0x7d6   :  { %1935 = vpush %v754_v40 }
 0x7ea   :  { %v1113_v19 = vpop.f32.mrf.mxu0 }
 0x7eb   :  { %1986 = vtanh.f32 %v1113_v19 }
 0x7ec   :  { %v1862_v41 = vpop.f32.mrf.mxu0 }
 0x7f2   :  { %v2422_v42 = vpop.f32.mrf.mxu0 }
 0x7f3   :  { %v1409_v40 = vadd.f32 %v1566_v12, %v2422_v42 }
 0x7f4   :  { %v1903_v43 = vpop.f32.mrf.mxu0 }
 0x7f8   :  { %v2424_v44 = vpop.eup %1986 }
 0x7f9   :  { %1226 = vrot.lane.b32.xlu1 %v2424_v44, %s2012_s19  ;;  %v1118_v7 = vsel %vm186_vm3, %v2424_v44, 0.0 }
 0x803   :  { %s1934_s9 = spop %1933 }
 0x804   :  { %v584_v45 = vstv %s1934_s9 }
 0x805   :  { %v585_v46 = vmul.f32 0.0078125, %v584_v45 }
 0x807   :  { %v586_v47 = vadd.f32 1e-05, %v585_v46  ;;  %s1936_s10 = spop %1935 }
 0x808   :  { %v756_v48 = vstv %s1936_s10 }
 0x809   :  { %1988 = vrsqrt.f32 %v586_v47  ;;  %v757_v49 = vmul.f32 0.0078125, %v756_v48 }
 0x80b   :  { %v758_v50 = vsub.f32 %v2318_v16, %v757_v49 }
 0x80d   :  { %v759_v51 = vmul.f32 %v758_v50, %v758_v50 }
 0x80f   :  { %v760_v36 = vsel %vm186_vm3, %v759_v51, 0.0 }
 0x810   :  { %761 = vadd.xlane.f32.xlu0 %v760_v36 }
 0x816   :  { %v1989_v53 = vpop.eup %1988 }
 0x817   :  { %v588_v54 = vmul.f32 %v1989_v53, %v572_v4 }
 0x819   :  { %v589_v55 = vadd.f32 %v588_v54, %v403_v29 }
 0x81d   :  { %933 = vadd.xlane.f32.xlu1 %v932_v56 }
 0x86b   :  { %v1227_v58 = vpop.permute.xlu1 %1226 }
 0x86c   :  { %v1229_v59 = vsel %vm34_vm1, %v2393_v25, %v1227_v58 }
 0x86d   :  { %1891 = vmatmul.mubr.msk.f32.vlgmr.msra.gmra.mxu1 %vm111_vm2, %v1229_v59 }
 0x899   :  { %v762_v60 = vpop.xlane.xlu0 %761 }
 0x89a   :  { %v763_v61 = vrot.slane %v762_v60, 4 }
 0x89c   :  { %v764_v16 = vadd.f32 %v763_v61, %v762_v60 }
 0x89e   :  { %v765_v62 = vrot.slane %v764_v16, 2 }
 0x8a0   :  { %v766_v63 = vadd.f32 %v765_v62, %v764_v16 }
 0x8a2   :  { %v767_v13 = vrot.slane %v766_v63, 1 }
 0x8a4   :  { %v768_v14 = vadd.f32 %v767_v13, %v766_v63 }
 0x8a6   :  { %1937 = vpush %v768_v14  ;;  %v934_v15 = vpop.xlane.xlu1 %933 }
 0x8a7   :  { %v935_v17 = vrot.slane %v934_v15, 4 }
 0x8a9   :  { %v936_v18 = vadd.f32 %v935_v17, %v934_v15 }
 0x8ab   :  { %v937_v20 = vrot.slane %v936_v18, 2 }
 0x8ad   :  { %v938_v21 = vadd.f32 %v937_v20, %v936_v18 }
 0x8af   :  { %v939_v22 = vrot.slane %v938_v21, 1 }
 0x8b1   :  { %v940_v23 = vadd.f32 %v939_v22, %v938_v21 }
 0x8b3   :  { %1939 = vpush %v940_v23 }
 0x8d7   :  { %s1938_s11 = spop %1937 }
 0x8d8   :  { %v770_v24 = vstv %s1938_s11 }
 0x8d9   :  { %v771_v26 = vmul.f32 0.0078125, %v770_v24 }
 0x8db   :  { %v772_v25 = vadd.f32 1e-05, %v771_v26 }
 0x8dd   :  { %1990 = vrsqrt.f32 %v772_v25 }
 0x8e4   :  { %s1940_s12 = spop %1939 }
 0x8e5   :  { %v942_v27 = vstv %s1940_s12 }
 0x8e6   :  { %v943_v1 = vmul.f32 0.0078125, %v942_v27 }
 0x8e8   :  { %v944_v2 = vsub.f32 %v2374_v52, %v943_v1 }
 0x8ea   :  { %v1991_v3 = vpop.eup %1990  ;;  %v945_v4 = vmul.f32 %v944_v2, %v944_v2 }
 0x8eb   :  { %v774_v28 = vmul.f32 %v1991_v3, %v758_v50 }
 0x8ec   :  { %v946_v5 = vsel %vm186_vm3, %v945_v4, 0.0 }
 0x8ed   :  { %947 = vadd.xlane.f32.xlu0 %v946_v5  ;;  %v775_v6 = vadd.f32 %v774_v28, %v589_v55 }
 0x8f1   :  { %1119 = vadd.xlane.f32.xlu0 %v1118_v7 }
 0x92d   :  { %v1299_v8 = vpop.f32.mrf.mxu1 }
 0x92e   :  { %1992 = vtanh.f32 %v1299_v8 }
 0x92f   :  { %v1892_v9 = vpop.f32.mrf.mxu1  ;;  %1994 = vtanh.f32 %v1409_v40 }
 0x93b   :  { %v2439_v57 = vpop.eup %1992 }
 0x93c   :  { %1412 = vrot.lane.b32.xlu0 %v2439_v57, %s2012_s19  ;;  %v1995_v19 = vpop.eup %1994  ;;  %v1304_v36 = vsel %vm186_vm3, %v2439_v57, 0.0 }
 0x976   :  { %v948_v52 = vpop.xlane.xlu0 %947 }
 0x977   :  { %v949_v29 = vrot.slane %v948_v52, 4 }
 0x979   :  { %v950_v10 = vadd.f32 %v949_v29, %v948_v52 }
 0x97a   :  { %v1120_v30 = vpop.xlane.xlu0 %1119 }
 0x97b   :  { %v951_v31 = vrot.slane %v950_v10, 2  ;;  %v1121_v32 = vrot.slane %v1120_v30, 4 }
 0x97d   :  { %v1122_v33 = vadd.f32 %v1121_v32, %v1120_v30  ;;  %v952_v34 = vadd.f32 %v951_v31, %v950_v10 }
 0x97f   :  { %v1123_v35 = vrot.slane %v1122_v33, 2  ;;  %v953_v11 = vrot.slane %v952_v34, 1 }
 0x981   :  { %v954_v37 = vadd.f32 %v953_v11, %v952_v34  ;;  %v1124_v38 = vadd.f32 %v1123_v35, %v1122_v33 }
 0x983   :  { %1941 = vpush %v954_v37  ;;  %v1125_v39 = vrot.slane %v1124_v38, 1 }
 0x985   :  { %v1126_v0 = vadd.f32 %v1125_v39, %v1124_v38 }
 0x987   :  { %1943 = vpush %v1126_v0 }
 0x9ae   :  { %v1413_v41 = vpop.permute.xlu0 %1412 }
 0x9af   :  { %v1415_v43 = vsel %vm34_vm1, %v1995_v19, %v1413_v41 }
 0x9b0   :  { %1921 = vmatmul.mubr.msk.f32.vlgmr.msra.gmra.mxu0 %vm111_vm2, %v1415_v43 }
 0x9b4   :  { %s1942_s15 = spop %1941 }
 0x9b5   :  { %v956_v45 = vstv %s1942_s15 }
 0x9b6   :  { %v957_v46 = vmul.f32 0.0078125, %v956_v45 }
 0x9b8   :  { %v958_v47 = vadd.f32 1e-05, %v957_v46  ;;  %s1944_s16 = spop %1943 }
 0x9b9   :  { %v1128_v48 = vstv %s1944_s16 }
 0x9ba   :  { %1996 = vrsqrt.f32 %v958_v47  ;;  %v1129_v49 = vmul.f32 0.0078125, %v1128_v48 }
 0x9bc   :  { %v1130_v50 = vsub.f32 %v2424_v44, %v1129_v49 }
 0x9be   :  { %v1131_v51 = vmul.f32 %v1130_v50, %v1130_v50 }
 0x9c0   :  { %v1132_v42 = vsel %vm186_vm3, %v1131_v51, 0.0 }
 0x9c1   :  { %1133 = vadd.xlane.f32.xlu1 %v1132_v42 }
 0x9c5   :  { %1305 = vadd.xlane.f32.xlu1 %v1304_v36 }
 0x9c7   :  { %v1997_v53 = vpop.eup %1996 }
 0x9c8   :  { %v960_v54 = vmul.f32 %v1997_v53, %v944_v2 }
 0x9ca   :  { %v961_v55 = vadd.f32 %v960_v54, %v775_v6 }
 0xa4a   :  { %v1134_v56 = vpop.xlane.xlu1 %1133 }
 0xa4b   :  { %v1135_v58 = vrot.slane %v1134_v56, 4 }
 0xa4d   :  { %v1136_v59 = vadd.f32 %v1135_v58, %v1134_v56 }
 0xa4e   :  { %v1306_v60 = vpop.xlane.xlu1 %1305 }
 0xa4f   :  { %v1137_v61 = vrot.slane %v1136_v59, 2  ;;  %v1307_v16 = vrot.slane %v1306_v60, 4 }
 0xa51   :  { %v1308_v62 = vadd.f32 %v1307_v16, %v1306_v60  ;;  %v1138_v63 = vadd.f32 %v1137_v61, %v1136_v59  ;;  %v1569_v60 = vld [vmem:[%s2470_s3] ss:$0 sm:$0xff] }
 0xa53   :  { %v1309_v44 = vrot.slane %v1308_v62, 2  ;;  %v1139_v13 = vrot.slane %v1138_v63, 1 }
 0xa55   :  { %v1140_v14 = vadd.f32 %v1139_v13, %v1138_v63  ;;  %v1310_v15 = vadd.f32 %v1309_v44, %v1308_v62  ;;  %v1533_v63 = vstv %s2471_s4 }
 0xa57   :  { %1945 = vpush %v1140_v14  ;;  %v1311_v17 = vrot.slane %v1310_v15, 1 }
 0xa59   :  { %v1312_v18 = vadd.f32 %v1311_v17, %v1310_v15 }
 0xa5b   :  { %1947 = vpush %v1312_v18 }
 0xa70   :  { %v1485_v20 = vpop.f32.mrf.mxu0 }
 0xa71   :  { %1998 = vtanh.f32 %v1485_v20 }
 0xa72   :  { %v1922_v21 = vpop.f32.mrf.mxu0 }
 0xa7e   :  { %v1999_v3 = vpop.eup %1998 }
 0xa7f   :  { %v1490_v4 = vsel %vm186_vm3, %v1999_v3, 0.0 }
 0xa88   :  { %s1946_s0 = spop %1945 }
 0xa89   :  { %v1142_v22 = vstv %s1946_s0 }
 0xa8a   :  { %v1143_v23 = vmul.f32 0.0078125, %v1142_v22 }
 0xa8c   :  { %v1144_v24 = vadd.f32 1e-05, %v1143_v23  ;;  %s1948_s17 = spop %1947 }
 0xa8d   :  { %v1314_v26 = vstv %s1948_s17 }
 0xa8e   :  { %2000 = vrsqrt.f32 %v1144_v24  ;;  %v1315_v25 = vmul.f32 0.0078125, %v1314_v26 }
 0xa90   :  { %v1316_v27 = vsub.f32 %v2439_v57, %v1315_v25 }
 0xa92   :  { %v1317_v1 = vmul.f32 %v1316_v27, %v1316_v27 }
 0xa94   :  { %v1318_v2 = vsel %vm186_vm3, %v1317_v1, 0.0 }
 0xa95   :  { %1319 = vadd.xlane.f32.xlu1 %v1318_v2 }
 0xa99   :  { %1491 = vadd.xlane.f32.xlu1 %v1490_v4 }
 0xa9b   :  { %v2001_v28 = vpop.eup %2000 }
 0xa9c   :  { %v1146_v5 = vmul.f32 %v2001_v28, %v1130_v50 }
 0xa9e   :  { %v1147_v6 = vadd.f32 %v1146_v5, %v961_v55 }
 0xb1e   :  { %v1320_v7 = vpop.xlane.xlu1 %1319 }
 0xb1f   :  { %v1321_v8 = vrot.slane %v1320_v7, 4 }
 0xb21   :  { %v1322_v9 = vadd.f32 %v1321_v8, %v1320_v7 }
 0xb22   :  { %v1492_v52 = vpop.xlane.xlu1 %1491 }
 0xb23   :  { %v1323_v29 = vrot.slane %v1322_v9, 2  ;;  %v1493_v10 = vrot.slane %v1492_v52, 4 }
 0xb25   :  { %v1494_v30 = vadd.f32 %v1493_v10, %v1492_v52  ;;  %v1324_v31 = vadd.f32 %v1323_v29, %v1322_v9 }
 0xb27   :  { %v1495_v57 = vrot.slane %v1494_v30, 2  ;;  %v1325_v32 = vrot.slane %v1324_v31, 1 }
 0xb29   :  { %v1326_v33 = vadd.f32 %v1325_v32, %v1324_v31  ;;  %v1496_v34 = vadd.f32 %v1495_v57, %v1494_v30 }
 0xb2b   :  { %1949 = vpush %v1326_v33  ;;  %v1497_v35 = vrot.slane %v1496_v34, 1 }
 0xb2d   :  { %v1498_v11 = vadd.f32 %v1497_v35, %v1496_v34 }
 0xb2f   :  { %1951 = vpush %v1498_v11 }
 0xb5c   :  { %s1950_s2 = spop %1949 }
 0xb5d   :  { %v1328_v37 = vstv %s1950_s2 }
 0xb5e   :  { %v1329_v38 = vmul.f32 0.0078125, %v1328_v37 }
 0xb60   :  { %v1330_v39 = vadd.f32 1e-05, %v1329_v38  ;;  %s1952_s18 = spop %1951 }
 0xb61   :  { %v1500_v0 = vstv %s1952_s18 }
 0xb62   :  { %2002 = vrsqrt.f32 %v1330_v39  ;;  %v1501_v12 = vmul.f32 0.0078125, %v1500_v0 }
 0xb64   :  { %v1502_v40 = vsub.f32 %v1999_v3, %v1501_v12 }
 0xb66   :  { %v1503_v19 = vmul.f32 %v1502_v40, %v1502_v40 }
 0xb68   :  { %v1504_v41 = vsel %vm186_vm3, %v1503_v19, 0.0 }
 0xb69   :  { %1505 = vadd.xlane.f32.xlu0 %v1504_v41 }
 0xb6f   :  { %v2003_v43 = vpop.eup %2002 }
 0xb70   :  { %v1332_v45 = vmul.f32 %v2003_v43, %v1316_v27 }
 0xb72   :  { %v1333_v46 = vadd.f32 %v1332_v45, %v1147_v6 }
 0xbf2   :  { %v1506_v47 = vpop.xlane.xlu0 %1505 }
 0xbf3   :  { %v1507_v48 = vrot.slane %v1506_v47, 4 }
 0xbf5   :  { %v1508_v49 = vadd.f32 %v1507_v48, %v1506_v47 }
 0xbf7   :  { %v1509_v50 = vrot.slane %v1508_v49, 2 }
 0xbf9   :  { %v1510_v51 = vadd.f32 %v1509_v50, %v1508_v49 }
 0xbfb   :  { %v1511_v42 = vrot.slane %v1510_v51, 1 }
 0xbfd   :  { %v1512_v36 = vadd.f32 %v1511_v42, %v1510_v51 }
 0xbff   :  { %1953 = vpush %v1512_v36 }
 0xc30   :  { %s1954_s19 = spop %1953 }
 0xc31   :  { %v1514_v53 = vstv %s1954_s19 }
 0xc32   :  { %v1515_v54 = vmul.f32 0.0078125, %v1514_v53 }
 0xc34   :  { %v1516_v55 = vadd.f32 1e-05, %v1515_v54 }
 0xc36   :  { %2004 = vrsqrt.f32 %v1516_v55 }
 0xc43   :  { %v2005_v56 = vpop.eup %2004 }
 0xc44   :  { %v1518_v58 = vmul.f32 %v2005_v56, %v1502_v40 }
 0xc46   :  { %v1519_v59 = vadd.f32 %v1518_v58, %v1333_v46 }
 0xc48   :  { %v1520_v61 = vmul.f32 0.125, %v1519_v59 }
 0xc4a   :  { %v1528_v16 = vmul.f32 %v1569_v60, %v1520_v61 }
 0xc4c   :  { %v1529_v62 = vsel %vm186_vm3, %v1528_v16, 0.0 }
 0xc4d   :  { %1530 = vadd.xlane.f32.xlu1 %v1529_v62 }
 0xcd6   :  { %v1531_v44 = vpop.xlane.xlu1 %1530 }
 0xcd7   :  { %v1534_v13 = vadd.f32 %v1533_v63, %v1531_v44 }
 0xcd9   :  { %v1570_v14 = vmul.f32 -1.442695, %v1534_v13 }
 0xcdb   :  { %2006 = vpow2.f32 %v1570_v14 }
 0xce8   :  { %v2007_v15 = vpop.eup %2006 }
 0xce9   :  { %v1538_v17 = vadd.f32 1.0, %v2007_v15 }
 0xceb   :  { %2008 = vrcp.f32 %v1538_v17 }
 0xcf8   :  { %v2009_v18 = vpop.eup %2008 }
 0xcf9   :  { %1542 = vst.msk [vmem:[%s2472_s5] sm:$0xf] %vm1541_vm4, %v2009_v18 }

</bundles_post_ra>
